<compile_context>
chip_gen: v6e
topology: v6e:2x2x1
jax: 0.10.0
libtpu: 0.0.40
codegen_flags: <defaults>
</compile_context>

<pallas_src>
import functools
import math

import jax
import jax.numpy as jnp
from jax.experimental import pallas as pl
from jax.experimental.pallas import tpu as pltpu


# lowbias32 hash constants (as signed int32) + golden-ratio seed mixer.
_M1 = 0x7FEB352D
_M2 = 0x846CA68B - (1 << 32)
_GOLDEN = 0x9E3779B1 - (1 << 32)


def _srl32(x, n):
    """Logical right shift of an int32 array by static amount n (via mask)."""
    return (x >> n) & jnp.int32((1 << (32 - n)) - 1)


def _hash32(x):
    """Murmur/lowbias32 finalizer: int32 counter -> well-mixed int32 bits."""
    x = x ^ _srl32(x, 16)
    x = x * jnp.int32(_M1)
    x = x ^ _srl32(x, 15)
    x = x * jnp.int32(_M2)
    x = x ^ _srl32(x, 16)
    return x


def _bits_to_open_unit(bits):
    """int32 bits -> float32 uniform in (0, 1] (safe for log)."""
    v = (bits & jnp.int32((1 << 24) - 1)).astype(jnp.float32)
    return (v + jnp.float32(1.0)) * jnp.float32(1.0 / (1 << 24))


def _bits_to_halfopen_unit(bits):
    """int32 bits -> float32 uniform in [0, 1)."""
    v = (bits & jnp.int32((1 << 24) - 1)).astype(jnp.float32)
    return v * jnp.float32(1.0 / (1 << 24))


def _gaussian_noise_kernel(seed_ref, x_ref, o_ref, *, sigma, block_rows, cols):
    # seed_ref: SMEM scalar-prefetch ref, shape (1,), int32
    # x_ref / o_ref: (block_rows, cols) VMEM tiles
    i = pl.program_id(0)
    half = block_rows // 2  # block_rows is a multiple of 16 -> half % 8 == 0

    # Global linear element index for the TOP half of this block; the bottom
    # half is offset by half*cols.  Unique per element => independent noise in
    # every tile / on every core without any PRNG state.
    row = jax.lax.broadcasted_iota(jnp.int32, (half, cols), 0)
    col = jax.lax.broadcasted_iota(jnp.int32, (half, cols), 1)
    g_top = (i * block_rows) * cols + row * cols + col
    g_bot = g_top + half * cols

    seed_mix = seed_ref[0] * jnp.int32(_GOLDEN)

    # Paired Box-Muller: one (u1, u2) pair -> two standard normals.
    u1 = _bits_to_open_unit(_hash32(g_top ^ seed_mix))      # (0, 1]
    u2 = _bits_to_halfopen_unit(_hash32(g_bot ^ seed_mix))  # [0, 1)
    r = jnp.sqrt(jnp.float32(-2.0) * jnp.log(u1))
    theta = jnp.float32(2.0 * math.pi) * u2
    s = jnp.float32(sigma)

    o_ref[:half, :] = x_ref[:half, :] + s * (r * jnp.cos(theta))
    o_ref[half:, :] = x_ref[half:, :] + s * (r * jnp.sin(theta))


def _round_up(a, m):
    return (a + m - 1) // m * m


def gaussian_noise(x, seed, *, sigma, training=True, cols=512,
                   max_block_rows=1024):
    """Pallas implementation of GaussianNoise.forward.

    Args:
      x: float array of any shape (flattened internally to a lane-dense slab).
      seed: python int / int32 scalar; pass a fresh seed per call to match
        PyTorch's fresh-noise-each-call semantics.
      sigma: noise std-dev.
      training: if False, returns x unchanged (nn.Module.eval()).
    """
    if not training:
        return x

    orig_shape = x.shape
    orig_dtype = x.dtype
    total = int(x.size)

    # Lane-dense layout: flatten to (rows, cols) with cols a large multiple of
    # 128 so stores are unmasked, full-lane vst.
    rows = max(1, -(-total // cols))
    # Block rows: multiple of 16 (keeps the cos/sin halves sublane-aligned),
    # capped at ~2 MiB/block f32 -> in+out double buffers ~8 MiB, safe on
    # v5e/v6e/v7x scoped-VMEM defaults while still amortizing grid overhead.
    block_rows = min(max_block_rows, _round_up(rows, 16))
    rows_padded = _round_up(rows, block_rows)
    padded_total = rows_padded * cols

    flat = jnp.ravel(x).astype(jnp.float32)
    if padded_total != total:
        flat = jnp.pad(flat, (0, padded_total - total))
    x2d = flat.reshape(rows_padded, cols)

    seed_arr = jnp.asarray([seed], dtype=jnp.int32)
    num_blocks = rows_padded // block_rows

    out2d = pl.pallas_call(
        functools.partial(_gaussian_noise_kernel, sigma=float(sigma),
                          block_rows=block_rows, cols=cols),
        out_shape=jax.ShapeDtypeStruct((rows_padded, cols), jnp.float32),
        grid_spec=pltpu.PrefetchScalarGridSpec(
            num_scalar_prefetch=1,
            grid=(num_blocks,),
            in_specs=[
                pl.BlockSpec((block_rows, cols), lambda i, seed_ref: (i, 0)),
            ],
            out_specs=pl.BlockSpec((block_rows, cols),
                                   lambda i, seed_ref: (i, 0)),
        ),
        compiler_params=pltpu.CompilerParams(
            # Counter-based (stateless) RNG -> safe to shard the row-block
            # axis across both TensorCores on v7x.
            dimension_semantics=("parallel",),
        ),
    )(seed_arr, x2d)

    out = out2d.reshape(-1)[:total].reshape(orig_shape)
    return out.astype(orig_dtype)


if __name__ == "__main__":
    key = jax.random.PRNGKey(0)
    B, C, H, W = 2, 4, 16, 16  # NCHW, matching the PyTorch convention
    x = jax.random.normal(key, (B, C, H, W), dtype=jnp.float32)
    sigma = 0.1

    # Training mode: adds Gaussian noise with std sigma.
    y_train = jax.block_until_ready(
        gaussian_noise(x, seed=0, sigma=sigma, training=True))

    # Eval mode: identity.
    y_eval = jax.block_until_ready(
        gaussian_noise(x, seed=0, sigma=sigma, training=False))

    # Sanity checks on semantics.
    assert y_train.shape == x.shape and y_train.dtype == x.dtype
    assert jnp.allclose(y_eval, x)
    diff = y_train - x
    assert float(jnp.max(jnp.abs(diff))) > 0.0          # noise is present
    d_std = float(jnp.std(diff))
    assert 0.2 * sigma < d_std < 5.0 * sigma             # ~sigma-scaled
    assert abs(float(jnp.mean(diff))) < 5.0 * sigma      # ~zero-mean

    # Fresh seed -> fresh noise (caller controls "fresh each call").
    y_train2 = jax.block_until_ready(
        gaussian_noise(x, seed=1, sigma=sigma, training=True))
    assert float(jnp.max(jnp.abs(y_train2 - y_train))) > 0.0

    print("KERNEL_OK")
</pallas_src>

<mosaic_0001>
module attributes {stable_mosaic.version = 11 : i64} {
  func.func @_gaussian_noise_kernel(%arg0: i32, %arg1: memref<1xi32, #tpu.memory_space<smem>>, %arg2: memref<16x512xf32, #tpu.memory_space<vmem>>, %arg3: memref<16x512xf32, #tpu.memory_space<vmem>>) attributes {dimension_semantics = [#tpu.dimension_semantics<parallel>], iteration_bounds = array<i64: 1>, scalar_prefetch = 1 : i64, scratch_operands = 0 : i64, tpu.core_type = #tpu.core_type<tc>, window_params = [{transform_indices = @transform_0, window_bounds = array<i64: 16, 512>}, {transform_indices = @transform_1, window_bounds = array<i64: 16, 512>}]} {
    %0 = tpu.iota {dimensions = array<i32: 0>} : vector<8x512xi32>
    %1 = tpu.iota {dimensions = array<i32: 1>} : vector<8x512xi32>
    %c16_i32 = arith.constant 16 : i32
    %2 = arith.muli %arg0, %c16_i32 : i32
    %c512_i32 = arith.constant 512 : i32
    %3 = arith.muli %2, %c512_i32 : i32
    %c512_i32_0 = arith.constant 512 : i32
    %4 = vector.broadcast %c512_i32_0 : i32 to vector<8x512xi32>
    %5 = arith.muli %0, %4 : vector<8x512xi32>
    %6 = vector.broadcast %3 : i32 to vector<8x512xi32>
    %7 = arith.addi %6, %5 : vector<8x512xi32>
    %8 = arith.addi %7, %1 : vector<8x512xi32>
    %c4096_i32 = arith.constant 4096 : i32
    %9 = vector.broadcast %c4096_i32 : i32 to vector<8x512xi32>
    %10 = arith.addi %8, %9 : vector<8x512xi32>
    %c0 = arith.constant 0 : index
    %11 = memref.load %arg1[%c0] : memref<1xi32, #tpu.memory_space<smem>>
    %c-1640531535_i32 = arith.constant -1640531535 : i32
    %12 = arith.muli %11, %c-1640531535_i32 : i32
    %13 = vector.broadcast %12 : i32 to vector<8x512xi32>
    %14 = arith.xori %8, %13 : vector<8x512xi32>
    %c16_i32_1 = arith.constant 16 : i32
    %15 = vector.broadcast %c16_i32_1 : i32 to vector<8x512xi32>
    %16 = arith.shrsi %14, %15 : vector<8x512xi32>
    %c65535_i32 = arith.constant 65535 : i32
    %17 = vector.broadcast %c65535_i32 : i32 to vector<8x512xi32>
    %18 = arith.andi %16, %17 : vector<8x512xi32>
    %19 = arith.xori %14, %18 : vector<8x512xi32>
    %c2146121005_i32 = arith.constant 2146121005 : i32
    %20 = vector.broadcast %c2146121005_i32 : i32 to vector<8x512xi32>
    %21 = arith.muli %19, %20 : vector<8x512xi32>
    %c15_i32 = arith.constant 15 : i32
    %22 = vector.broadcast %c15_i32 : i32 to vector<8x512xi32>
    %23 = arith.shrsi %21, %22 : vector<8x512xi32>
    %c131071_i32 = arith.constant 131071 : i32
    %24 = vector.broadcast %c131071_i32 : i32 to vector<8x512xi32>
    %25 = arith.andi %23, %24 : vector<8x512xi32>
    %26 = arith.xori %21, %25 : vector<8x512xi32>
    %c-2073254261_i32 = arith.constant -2073254261 : i32
    %27 = vector.broadcast %c-2073254261_i32 : i32 to vector<8x512xi32>
    %28 = arith.muli %26, %27 : vector<8x512xi32>
    %c16_i32_2 = arith.constant 16 : i32
    %29 = vector.broadcast %c16_i32_2 : i32 to vector<8x512xi32>
    %30 = arith.shrsi %28, %29 : vector<8x512xi32>
    %c65535_i32_3 = arith.constant 65535 : i32
    %31 = vector.broadcast %c65535_i32_3 : i32 to vector<8x512xi32>
    %32 = arith.andi %30, %31 : vector<8x512xi32>
    %33 = arith.xori %28, %32 : vector<8x512xi32>
    %c16777215_i32 = arith.constant 16777215 : i32
    %34 = vector.broadcast %c16777215_i32 : i32 to vector<8x512xi32>
    %35 = arith.andi %33, %34 : vector<8x512xi32>
    %36 = arith.sitofp %35 : vector<8x512xi32> to vector<8x512xf32>
    %cst = arith.constant 1.000000e+00 : f32
    %37 = vector.broadcast %cst : f32 to vector<8x512xf32>
    %38 = arith.addf %36, %37 : vector<8x512xf32>
    %cst_4 = arith.constant 5.96046448E-8 : f32
    %39 = vector.broadcast %cst_4 : f32 to vector<8x512xf32>
    %40 = arith.mulf %38, %39 : vector<8x512xf32>
    %41 = vector.broadcast %12 : i32 to vector<8x512xi32>
    %42 = arith.xori %10, %41 : vector<8x512xi32>
    %c16_i32_5 = arith.constant 16 : i32
    %43 = vector.broadcast %c16_i32_5 : i32 to vector<8x512xi32>
    %44 = arith.shrsi %42, %43 : vector<8x512xi32>
    %c65535_i32_6 = arith.constant 65535 : i32
    %45 = vector.broadcast %c65535_i32_6 : i32 to vector<8x512xi32>
    %46 = arith.andi %44, %45 : vector<8x512xi32>
    %47 = arith.xori %42, %46 : vector<8x512xi32>
    %c2146121005_i32_7 = arith.constant 2146121005 : i32
    %48 = vector.broadcast %c2146121005_i32_7 : i32 to vector<8x512xi32>
    %49 = arith.muli %47, %48 : vector<8x512xi32>
    %c15_i32_8 = arith.constant 15 : i32
    %50 = vector.broadcast %c15_i32_8 : i32 to vector<8x512xi32>
    %51 = arith.shrsi %49, %50 : vector<8x512xi32>
    %c131071_i32_9 = arith.constant 131071 : i32
    %52 = vector.broadcast %c131071_i32_9 : i32 to vector<8x512xi32>
    %53 = arith.andi %51, %52 : vector<8x512xi32>
    %54 = arith.xori %49, %53 : vector<8x512xi32>
    %c-2073254261_i32_10 = arith.constant -2073254261 : i32
    %55 = vector.broadcast %c-2073254261_i32_10 : i32 to vector<8x512xi32>
    %56 = arith.muli %54, %55 : vector<8x512xi32>
    %c16_i32_11 = arith.constant 16 : i32
    %57 = vector.broadcast %c16_i32_11 : i32 to vector<8x512xi32>
    %58 = arith.shrsi %56, %57 : vector<8x512xi32>
    %c65535_i32_12 = arith.constant 65535 : i32
    %59 = vector.broadcast %c65535_i32_12 : i32 to vector<8x512xi32>
    %60 = arith.andi %58, %59 : vector<8x512xi32>
    %61 = arith.xori %56, %60 : vector<8x512xi32>
    %c16777215_i32_13 = arith.constant 16777215 : i32
    %62 = vector.broadcast %c16777215_i32_13 : i32 to vector<8x512xi32>
    %63 = arith.andi %61, %62 : vector<8x512xi32>
    %64 = arith.sitofp %63 : vector<8x512xi32> to vector<8x512xf32>
    %cst_14 = arith.constant 5.96046448E-8 : f32
    %65 = vector.broadcast %cst_14 : f32 to vector<8x512xf32>
    %66 = arith.mulf %64, %65 : vector<8x512xf32>
    %67 = math.log %40 : vector<8x512xf32>
    %cst_15 = arith.constant -2.000000e+00 : f32
    %68 = vector.broadcast %cst_15 : f32 to vector<8x512xf32>
    %69 = arith.mulf %68, %67 : vector<8x512xf32>
    %70 = math.sqrt %69 : vector<8x512xf32>
    %cst_16 = arith.constant 6.28318548 : f32
    %71 = vector.broadcast %cst_16 : f32 to vector<8x512xf32>
    %72 = arith.mulf %71, %66 : vector<8x512xf32>
    %c0_17 = arith.constant 0 : index
    %c0_18 = arith.constant 0 : index
    %73 = vector.load %arg2[%c0_17, %c0_18] : memref<16x512xf32, #tpu.memory_space<vmem>>, vector<8x512xf32>
    %74 = math.cos %72 : vector<8x512xf32>
    %75 = arith.mulf %70, %74 : vector<8x512xf32>
    %cst_19 = arith.constant 1.000000e-01 : f32
    %76 = vector.broadcast %cst_19 : f32 to vector<8x512xf32>
    %77 = arith.mulf %76, %75 : vector<8x512xf32>
    %78 = arith.addf %73, %77 : vector<8x512xf32>
    %c0_20 = arith.constant 0 : index
    %c0_21 = arith.constant 0 : index
    %79 = vector.load %arg3[%c0_20, %c0_21] : memref<16x512xf32, #tpu.memory_space<vmem>>, vector<8x512xf32>
    tpu.vector_store %arg3[%c0_20, %c0_21], %78 {strides = array<i32>} : memref<16x512xf32, #tpu.memory_space<vmem>>, vector<8x512xf32>,
    %c8 = arith.constant 8 : index
    %c0_22 = arith.constant 0 : index
    %80 = vector.load %arg2[%c8, %c0_22] : memref<16x512xf32, #tpu.memory_space<vmem>>, vector<8x512xf32>
    %81 = math.sin %72 : vector<8x512xf32>
    %82 = arith.mulf %70, %81 : vector<8x512xf32>
    %cst_23 = arith.constant 1.000000e-01 : f32
    %83 = vector.broadcast %cst_23 : f32 to vector<8x512xf32>
    %84 = arith.mulf %83, %82 : vector<8x512xf32>
    %85 = arith.addf %80, %84 : vector<8x512xf32>
    %c8_24 = arith.constant 8 : index
    %c0_25 = arith.constant 0 : index
    %86 = vector.load %arg3[%c8_24, %c0_25] : memref<16x512xf32, #tpu.memory_space<vmem>>, vector<8x512xf32>
    tpu.vector_store %arg3[%c8_24, %c0_25], %85 {strides = array<i32>} : memref<16x512xf32, #tpu.memory_space<vmem>>, vector<8x512xf32>,
    return
  }
  func.func @transform_0(%arg0: i32, %arg1: memref<1xi32, #tpu.memory_space<smem>>) -> (i32, i32) {
    %c0_i32 = arith.constant 0 : i32
    %c0_i32_0 = arith.constant 0 : i32
    return %arg0, %c0_i32 : i32, i32
  }
  func.func @transform_1(%arg0: i32, %arg1: memref<1xi32, #tpu.memory_space<smem>>) -> (i32, i32) {
    %c0_i32 = arith.constant 0 : i32
    %c0_i32_0 = arith.constant 0 : i32
    return %arg0, %c0_i32 : i32, i32
  }
}

</mosaic_0001>

<bundles_post_ra>
// kernel: tpu_custom_call.1
= control target key start
LH: loop header
LB: loop body
LE: loop exit
PB: predicated region body
PF: predicated region fallthrough
CT: control target
= control target key end

     0   :  { %8 = vsyncpa [#allocation5], 0  ;;  %s1695_s0 = inlined_call_operand.<no memory space> [shape: s32[1], index: 0, kind: input, shape index: {}]   ;;  %s1696_s1 = inlined_call_operand.hbm [shape: f32[16,512], index: 1, kind: input, shape index: {}]   ;;  %s1697_s2 = inlined_call_operand.hbm [shape: f32[16,512], index: 2, kind: output, shape index: {}]  }
   0x1   :  { %9 = vsyncpa [#allocation6], 0  ;;  %s1258_s9 = smov [#allocation4]  }
   0x2   :  { %s15_s10 = sshll.u32 %s1258_s9, 4  ;;  %s16_s10 = int_to_ptr.vmem [resolvable:$true] %s15_s10 }
   0x3   :  { %s1222_s11 = scalar_lea.vmem %s16_s10, 1024  ;;  %p1227_p1 = scmp.lt.s32.totalorder %s16_s10, %s16_s10 }
   0x4   :  { %p1223_p0 = scmp.ne.s32.totalorder %s16_s10, %s1222_s11  ;;  %p1228_p2 = scmp.lt.s32.totalorder %s1222_s11, %s1222_s11 }
   0x6   :  { %p1229_p3 = por %p1228_p2, %p1227_p1 }
   0x8   :  { %p1230_p4 = pnand %p1229_p3, %p1223_p0 }
   0xa   :  { %1233 = shalt.err (!%p1230_p4)
}
   0xb   :  { %s1259_s12 = smov 512   ;;  %s1260_s13 = smov 32  }
   0xc   :  { %21 = dma.hbm_to_vmem [thread:$0]  %s1696_s1, 1024, %s16_s10, [#allocation5], %s1259_s12, %s1259_s12, %s1260_s13  }
   0xd   :  { %1254 = dma.done.wait [#allocation5], 1024  }
   0xe   :  { %1255 = vsyncadd [#allocation5], 4294966272  ;;  %v25_v0 = vlaneseq  ;;  %s45_s18 = smul.u32 2654435761, %s1695_s0  ;;  %s1267_s0 = smov [#allocation7]  }
   0xf   :  { %s1088_s1 = sshll.u32 %s1267_s0, 4  ;;  %s1089_s1 = int_to_ptr.vmem [resolvable:$true] %s1088_s1 }
  0x10   :  { %v26_v1 = vshrl.u32 %v25_v0, 7  ;;  %v28_v2 = vand.u32 127, %v25_v0  ;;  %v46_v11 = vstv %s45_s18  ;;  %s1234_s19 = scalar_lea.vmem %s1089_s1, 1024  ;;  %p1239_p6 = scmp.lt.s32.totalorder %s1089_s1, %s1089_s1 }
  0x11   :  { %p1235_p5 = scmp.ne.s32.totalorder %s1089_s1, %s1234_s19  ;;  %p1240_p7 = scmp.lt.s32.totalorder %s1234_s19, %s1234_s19 }
  0x12   :  { %v33_v3 = vmul.u32 512, %v26_v1  ;;  %v29_v4 = vadd.s32 128, %v28_v2  ;;  %v30_v5 = vadd.s32 256, %v28_v2  ;;  %v31_v6 = vadd.s32 384, %v28_v2 }
  0x13   :  { %p1241_p8 = por %p1240_p7, %p1239_p6 }
  0x14   :  { %v36_v7 = vadd.s32 %v33_v3, %v28_v2  ;;  %v37_v8 = vadd.s32 %v33_v3, %v29_v4  ;;  %v38_v9 = vadd.s32 %v33_v3, %v30_v5  ;;  %v39_v10 = vadd.s32 %v33_v3, %v31_v6 }
  0x15   :  { %p1242_p9 = pnand %p1241_p8, %p1235_p5 }
  0x16   :  { %v40_v12 = vadd.s32 4096, %v36_v7  ;;  %v47_v13 = vxor.u32 %v46_v11, %v36_v7  ;;  %v41_v14 = vadd.s32 4096, %v37_v8  ;;  %v48_v15 = vxor.u32 %v46_v11, %v37_v8 }
  0x17   :  { %v42_v16 = vadd.s32 4096, %v38_v9  ;;  %v49_v17 = vxor.u32 %v46_v11, %v38_v9  ;;  %v43_v18 = vadd.s32 4096, %v39_v10  ;;  %v50_v19 = vxor.u32 %v46_v11, %v39_v10 }
  0x18   :  { %v1100_v20 = vshrl.u32 %v47_v13, 16  ;;  %v111_v21 = vxor.u32 %v46_v11, %v40_v12  ;;  %v1101_v22 = vshrl.u32 %v48_v15, 16  ;;  %v112_v23 = vxor.u32 %v46_v11, %v41_v14 }
  0x19   :  { %v1102_v24 = vshrl.u32 %v49_v17, 16  ;;  %v113_v25 = vxor.u32 %v46_v11, %v42_v16  ;;  %v114_v26 = vxor.u32 %v46_v11, %v43_v18  ;;  %v1103_v33 = vshrl.u32 %v50_v19, 16 }
  0x1a   :  { %v59_v27 = vxor.u32 %v1100_v20, %v47_v13  ;;  %v1112_v28 = vshrl.u32 %v111_v21, 16  ;;  %v60_v29 = vxor.u32 %v1101_v22, %v48_v15  ;;  %v1113_v30 = vshrl.u32 %v112_v23, 16 }
  0x1b   :  { %v61_v31 = vxor.u32 %v1102_v24, %v49_v17  ;;  %v1114_v32 = vshrl.u32 %v113_v25, 16  ;;  %v1115_v34 = vshrl.u32 %v114_v26, 16  ;;  %v62_v48 = vxor.u32 %v1103_v33, %v50_v19 }
  0x1c   :  { %v63_v35 = vmul.u32 2146121005, %v59_v27  ;;  %v123_v36 = vxor.u32 %v1112_v28, %v111_v21  ;;  %v64_v37 = vmul.u32 2146121005, %v60_v29  ;;  %v124_v38 = vxor.u32 %v1113_v30, %v112_v23 }
  0x1d   :  { %v65_v39 = vmul.u32 2146121005, %v61_v31  ;;  %v125_v40 = vxor.u32 %v1114_v32, %v113_v25  ;;  %v126_v41 = vxor.u32 %v1115_v34, %v114_v26  ;;  %v66_v63 = vmul.u32 2146121005, %v62_v48 }
  0x1e   :  { %v1104_v42 = vshrl.u32 %v63_v35, 15  ;;  %v127_v43 = vmul.u32 2146121005, %v123_v36  ;;  %v1105_v44 = vshrl.u32 %v64_v37, 15  ;;  %v128_v45 = vmul.u32 2146121005, %v124_v38 }
  0x1f   :  { %v1106_v46 = vshrl.u32 %v65_v39, 15  ;;  %v129_v47 = vmul.u32 2146121005, %v125_v40  ;;  %v130_v49 = vmul.u32 2146121005, %v126_v41  ;;  %v1107_v10 = vshrl.u32 %v66_v63, 15 }
  0x20   :  { %v75_v50 = vxor.u32 %v1104_v42, %v63_v35  ;;  %v1116_v51 = vshrl.u32 %v127_v43, 15  ;;  %v76_v52 = vxor.u32 %v1105_v44, %v64_v37  ;;  %v1117_v53 = vshrl.u32 %v128_v45, 15 }
  0x21   :  { %v77_v54 = vxor.u32 %v1106_v46, %v65_v39  ;;  %v1118_v55 = vshrl.u32 %v129_v47, 15  ;;  %v1119_v56 = vshrl.u32 %v130_v49, 15  ;;  %v78_v21 = vxor.u32 %v1107_v10, %v66_v63 }
  0x22   :  { %v79_v57 = vmul.u32 2221713035, %v75_v50  ;;  %v139_v58 = vxor.u32 %v1116_v51, %v127_v43  ;;  %v80_v59 = vmul.u32 2221713035, %v76_v52  ;;  %v140_v60 = vxor.u32 %v1117_v53, %v128_v45 }
  0x23   :  { %v81_v61 = vmul.u32 2221713035, %v77_v54  ;;  %v141_v62 = vxor.u32 %v1118_v55, %v129_v47  ;;  %v142_v5 = vxor.u32 %v1119_v56, %v130_v49  ;;  %v82_v32 = vmul.u32 2221713035, %v78_v21 }
  0x24   :  { %v1108_v0 = vshrl.u32 %v79_v57, 16  ;;  %v143_v1 = vmul.u32 2221713035, %v139_v58  ;;  %v144_v2 = vmul.u32 2221713035, %v140_v60  ;;  %v1109_v3 = vshrl.u32 %v80_v59, 16 }
  0x25   :  { %v145_v4 = vmul.u32 2221713035, %v141_v62  ;;  %v1110_v14 = vshrl.u32 %v81_v61, 16  ;;  %v146_v16 = vmul.u32 2221713035, %v142_v5  ;;  %v1111_v43 = vshrl.u32 %v82_v32, 16 }
  0x26   :  { %v91_v6 = vxor.u32 %v1108_v0, %v79_v57  ;;  %v1120_v7 = vshrl.u32 %v143_v1, 16  ;;  %v1121_v8 = vshrl.u32 %v144_v2, 16  ;;  %v92_v15 = vxor.u32 %v1109_v3, %v80_v59 }
  0x27   :  { %v1122_v9 = vshrl.u32 %v145_v4, 16  ;;  %v93_v25 = vxor.u32 %v1110_v14, %v81_v61  ;;  %v1123_v27 = vshrl.u32 %v146_v16, 16  ;;  %v1300_v54 = vxor.u32 %v1111_v43, %v82_v32 }
  0x28   :  { %v95_v11 = vand.u32 16777215, %v91_v6  ;;  %v155_v12 = vxor.u32 %v1120_v7, %v143_v1  ;;  %v156_v13 = vxor.u32 %v1121_v8, %v144_v2  ;;  %v96_v26 = vand.u32 16777215, %v92_v15 }
  0x29   :  { %v157_v20 = vxor.u32 %v1122_v9, %v145_v4  ;;  %v97_v35 = vand.u32 16777215, %v93_v25  ;;  %v158_v37 = vxor.u32 %v1123_v27, %v146_v16  ;;  %v98_v63 = vand.u32 16777215, %v1300_v54 }
  0x2a   :  { %v99_v17 = vcvt.s32.f32 %v95_v11  ;;  %v159_v18 = vand.u32 16777215, %v155_v12  ;;  %v160_v19 = vand.u32 16777215, %v156_v13  ;;  %v100_v36 = vcvt.s32.f32 %v96_v26 }
  0x2b   :  { %v161_v31 = vand.u32 16777215, %v157_v20  ;;  %v101_v42 = vcvt.s32.f32 %v97_v35  ;;  %v162_v47 = vand.u32 16777215, %v158_v37  ;;  %v1261_v8 = vmov 683565275  }
  0x2c   :  { %v103_v22 = vadd.f32 1.0, %v99_v17  ;;  %v163_v23 = vcvt.s32.f32 %v159_v18  ;;  %v164_v24 = vcvt.s32.f32 %v160_v19  ;;  %v104_v45 = vadd.f32 1.0, %v100_v36 }
  0x2d   :  { %v165_v39 = vcvt.s32.f32 %v161_v31  ;;  %v105_v53 = vadd.f32 1.0, %v101_v42  ;;  %v166_v58 = vcvt.s32.f32 %v162_v47  ;;  %v1262_v10 = vmov 2475754826  }
  0x2e   :  { %v107_v28 = vmul.f32 5.9604645e-08, %v103_v22  ;;  %v167_v29 = vmul.f32 5.9604645e-08, %v163_v23  ;;  %v168_v30 = vmul.f32 5.9604645e-08, %v164_v24  ;;  %v108_v56 = vmul.f32 5.9604645e-08, %v104_v45 }
  0x2f   :  { %v169_v49 = vmul.f32 5.9604645e-08, %v165_v39  ;;  %v109_v1 = vmul.f32 5.9604645e-08, %v105_v53  ;;  %v1309_v2 = vmul.f32 5.9604645e-08, %v166_v58  ;;  %v1263_v12 = vmov 2131351028  }
  0x30   :  { %v1292_v33 = vmul.f32 6.2831855, %v167_v29  ;;  %v1294_v34 = vmul.f32 6.2831855, %v168_v30  ;;  %1182 = vlog2.f32 %v107_v28  ;;  %v1264_v14 = vmov 2102212464  }
  0x31   :  { %v1304_v59 = vmul.f32 6.2831855, %v169_v49  ;;  %1184 = vlog2.f32 %v108_v56  ;;  %v1265_v18 = vmov 920167782   ;;  %v1266_v24 = vmov 1326507024  }
  0x32   :  { %v222_v38 = vand.u32 2139095040, %v1292_v33  ;;  %v325_v40 = vand.u32 2139095040, %v1294_v34  ;;  %v219_v44 = vand.u32 2147483647, %v1292_v33  ;;  %v322_v52 = vand.u32 2147483647, %v1294_v34 }
  0x33   :  { %v428_v6 = vand.u32 2139095040, %v1304_v59  ;;  %1186 = vlog2.f32 %v109_v1  ;;  %v425_v47 = vand.u32 2147483647, %v1304_v59  ;;  %vm221_vm14 = vcmp.lt.s32.totalorder %v1292_v33, 0 }
  0x34   :  { %v223_v41 = vshrl.u32 %v222_v38, 23  ;;  %v326_v46 = vshrl.u32 %v325_v40, 23  ;;  %v226_v55 = vand.u32 8388607, %v219_v44  ;;  %v329_v62 = vand.u32 8388607, %v322_v52 }
  0x36   :  { %v1124_v48 = vadd.s32 4294967169, %v223_v41  ;;  %v1128_v50 = vadd.s32 4294967169, %v326_v46  ;;  %v227_v0 = vor.u32 8388608, %v226_v55  ;;  %v330_v20 = vor.u32 8388608, %v329_v62 }
  0x38   :  { %v229_v51 = vadd.s32 1, %v1124_v48  ;;  %v332_v57 = vadd.s32 1, %v1128_v50  ;;  %v267_v27 = vshll.u32 %v227_v0, 8  ;;  %v1337_v56 = vshll.u32 %v330_v20, 8 }
  0x3a   :  { %vm230_vm0 = vcmp.gt.s32.totalorder %v229_v51, 0  ;;  %vm333_vm1 = vcmp.gt.s32.totalorder %v332_v57, 0 }
  0x3b   :  { %v231_v60 = vsel %vm230_vm0, %v229_v51, 0  ;;  %v334_v5 = vsel %vm333_vm1, %v332_v57, 0  ;;  %v429_v57 = vshrl.u32 %v428_v6, 23  ;;  %vm1441_vm0 = vcmp.le.f32.partialorder %v219_v44, 0.7853982 }
  0x3c   :  { %v233_v61 = vand.u32 31, %v231_v60  ;;  %v232_v3 = vshrl.u32 %v231_v60, 5  ;;  %v336_v28 = vand.u32 31, %v334_v5 }
  0x3d   :  { %v1183_v7 = vpop.eup %1182 }
  0x3e   :  { %v234_v4 = vsub.s32 32, %v233_v61  ;;  %v236_v9 = vshll.u32 %v1261_v8, %v233_v61  ;;  %v239_v11 = vshll.u32 %v1262_v10, %v233_v61  ;;  %v242_v13 = vshll.u32 %v1263_v12, %v233_v61  ;;  %v1185_v58 = vpop.eup %1184 }
  0x3f   :  { %v245_v15 = vshll.u32 %v1264_v14, %v233_v61  ;;  %v248_v19 = vshll.u32 %v1265_v18, %v233_v61  ;;  %v172_v26 = vmul.f32 0.6931472, %v1183_v7  ;;  %vm251_vm2 = vcmp.lt.s32.totalorder %v232_v3, 1 }
  0x40   :  { %v237_v16 = vshrl.u32 %v1262_v10, %v234_v4  ;;  %v240_v17 = vshrl.u32 %v1263_v12, %v234_v4  ;;  %v235_v21 = vshrl.u32 %v1261_v8, %v234_v4  ;;  %v243_v22 = vshrl.u32 %v1264_v14, %v234_v4 }
  0x41   :  { %v246_v23 = vshrl.u32 %v1265_v18, %v234_v4  ;;  %v249_v25 = vshrl.u32 %v1266_v24, %v234_v4  ;;  %vm252_vm3 = vcmp.lt.s32.totalorder %v232_v3, 2  ;;  %vm253_vm4 = vcmp.lt.s32.totalorder %v232_v3, 3 }
  0x42   :  { %v238_v29 = vor.u32 %v237_v16, %v236_v9  ;;  %v241_v30 = vor.u32 %v240_v17, %v239_v11  ;;  %v244_v31 = vor.u32 %v243_v22, %v242_v13  ;;  %vm254_vm5 = vcmp.lt.s32.totalorder %v232_v3, 4 }
  0x43   :  { %v247_v32 = vor.u32 %v246_v23, %v245_v15  ;;  %v250_v35 = vor.u32 %v249_v25, %v248_v19  ;;  %v1339_v60 = vmul.f32 -2.0, %v172_v26  ;;  %v335_v61 = vshrl.u32 %v334_v5, 5 }
  0x44   :  { %v255_v36 = vsel %vm251_vm2, %v235_v21, %v238_v29  ;;  %v256_v37 = vsel %vm254_vm5, %v244_v31, 2102212464  ;;  %v259_v38 = vsel %vm251_vm2, %v238_v29, %v241_v30  ;;  %v263_v42 = vsel %vm251_vm2, %v241_v30, %v244_v31 }
  0x45   :  { %v260_v39 = vsel %vm254_vm5, %v247_v32, 920167782  ;;  %v257_v40 = vsel %vm253_vm4, %v241_v30, %v256_v37  ;;  %v264_v43 = vsel %vm254_vm5, %v250_v35, 1326507024  ;;  %v337_v62 = vsub.s32 32, %v336_v28 }
  0x46   :  { %v261_v41 = vsel %vm253_vm4, %v244_v31, %v260_v39  ;;  %v265_v46 = vsel %vm253_vm4, %v247_v32, %v264_v43  ;;  %v258_v48 = vsel %vm252_vm3, %v255_v36, %v257_v40  ;;  %v339_v0 = vshll.u32 %v1261_v8, %v336_v28  ;;  %v1187_v40 = vpop.eup %1186 }
  0x47   :  { %v262_v45 = vsel %vm252_vm3, %v259_v38, %v261_v41  ;;  %v266_v49 = vsel %vm252_vm3, %v263_v42, %v265_v46  ;;  %v274_v1 = vmul.u32 %v267_v27, %v258_v48  ;;  %v342_v3 = vshll.u32 %v1262_v10, %v336_v28 }
  0x48   :  { %v1330_v50 = vmul.u32.u64.low %v267_v27, %v262_v45  ;;  %v1331_v51 = vmul.u32.u64.high %v267_v27, %v262_v45, %v1330_v50  ;;  %v1334_v53 = vmul.u32.u64.low %v267_v27, %v266_v49  ;;  %v1335_v55 = vmul.u32.u64.high %v267_v27, %v266_v49, %v1334_v53 }
  0x49   :  { %v345_v4 = vshll.u32 %v1263_v12, %v336_v28  ;;  %v348_v7 = vshll.u32 %v1264_v14, %v336_v28  ;;  %v340_v11 = vshrl.u32 %v1262_v10, %v337_v62  ;;  %v343_v6 = vshrl.u32 %v1263_v12, %v337_v62 }
  0x4a   :  { %v277_v9 = vadd.s32 1, %v1331_v51  ;;  %v351_v13 = vshll.u32 %v1265_v18, %v336_v28  ;;  %vm276_vm6 = vc.u32 %v1335_v55, %v1330_v50  ;;  %v346_v5 = vshrl.u32 %v1264_v14, %v337_v62 }
  0x4b   :  { %v349_v15 = vshrl.u32 %v1265_v18, %v337_v62  ;;  %v1132_v16 = vadd.s32 4294967169, %v429_v57  ;;  %v341_v19 = vor.u32 %v340_v11, %v339_v0  ;;  %v344_v20 = vor.u32 %v343_v6, %v342_v3 }
  0x4c   :  { %v278_v17 = vsel %vm276_vm6, %v277_v9, %v1331_v51  ;;  %v352_v21 = vshrl.u32 %v1266_v24, %v337_v62  ;;  %v347_v23 = vor.u32 %v346_v5, %v345_v4  ;;  %vm354_vm7 = vcmp.lt.s32.totalorder %v335_v61, 1 }
  0x4d   :  { %v279_v22 = vadd.s32 %v278_v17, %v274_v1  ;;  %v350_v25 = vor.u32 %v349_v15, %v348_v7  ;;  %1188 = vrsqrt.f32 %v1339_v60  ;;  %v338_v26 = vshrl.u32 %v1261_v8, %v337_v62 }
  0x4e   :  { %v353_v27 = vor.u32 %v352_v21, %v351_v13  ;;  %vm356_vm8 = vcmp.lt.s32.totalorder %v335_v61, 3  ;;  %vm355_vm9 = vcmp.lt.s32.totalorder %v335_v61, 2  ;;  %vm357_vm10 = vcmp.lt.s32.totalorder %v335_v61, 4 }
  0x4f   :  { %v280_v28 = vadd.s32 536870912, %v279_v22  ;;  %v362_v29 = vsel %vm354_vm7, %v341_v19, %v344_v20  ;;  %v174_v30 = vmul.f32 0.6931472, %v1185_v58  ;;  %v359_v31 = vsel %vm357_vm10, %v347_v23, 2102212464 }
  0x50   :  { %v363_v32 = vsel %vm357_vm10, %v350_v25, 920167782  ;;  %v102_v35 = vcvt.s32.f32 %v98_v63  ;;  %v366_v38 = vsel %vm354_vm7, %v344_v20, %v347_v23  ;;  %v1365_v39 = vmul.f32 6.2831855, %v1309_v2 }
  0x51   :  { %v1360_v36 = vshrl.u32 %v280_v28, 30  ;;  %v364_v37 = vsel %vm356_vm8, %v347_v23, %v363_v32  ;;  %v358_v41 = vsel %vm354_vm7, %v338_v26, %v341_v19  ;;  %v360_v42 = vsel %vm356_vm8, %v344_v20, %v359_v31 }
  0x52   :  { %v365_v43 = vsel %vm355_vm9, %v362_v29, %v364_v37  ;;  %v367_v45 = vsel %vm357_vm10, %v353_v27, 1326507024  ;;  %v432_v46 = vand.u32 8388607, %v425_v47  ;;  %v435_v48 = vadd.s32 1, %v1132_v16 }
  0x53   :  { %v282_v54 = vshll.u32 %v1360_v36, 30  ;;  %v368_v63 = vsel %vm356_vm8, %v350_v25, %v367_v45  ;;  %v1374_v49 = vmul.f32 -2.0, %v174_v30  ;;  %v361_v58 = vsel %vm355_vm9, %v358_v41, %v360_v42 }
  0x54   :  { %v369_v2 = vsel %vm355_vm9, %v366_v38, %v368_v63  ;;  %v1378_v51 = vmul.u32.u64.low %v1337_v56, %v365_v43  ;;  %v1379_v53 = vmul.u32.u64.high %v1337_v56, %v365_v43, %v1378_v51  ;;  %v106_v1 = vadd.f32 1.0, %v102_v35 }
  0x55   :  { %v1382_v57 = vsub.s32 %v279_v22, %v282_v54  ;;  %v1386_v62 = vmul.u32.u64.low %v1337_v56, %v369_v2  ;;  %v1387_v0 = vmul.u32.u64.high %v1337_v56, %v369_v2, %v1386_v62  ;;  %v433_v4 = vor.u32 8388608, %v432_v46 }
  0x56   :  { %vm436_vm11 = vcmp.gt.s32.totalorder %v435_v48, 0  ;;  %1190 = vrsqrt.f32 %v1374_v49  ;;  %v377_v7 = vmul.u32 %v1337_v56, %v361_v58  ;;  %v380_v9 = vadd.s32 1, %v1379_v53 }
  0x57   :  { %v285_v3 = vsub.s32 0, %v1382_v57  ;;  %v531_v11 = vand.u32 2139095040, %v1365_v39  ;;  %vm379_vm12 = vc.u32 %v1387_v0, %v1378_v51  ;;  %v437_v6 = vsel %vm436_vm11, %v435_v48, 0 }
  0x58   :  { %v1397_v13 = vmul.f32 5.9604645e-08, %v106_v1  ;;  %v528_v5 = vand.u32 2147483647, %v1365_v39  ;;  %v381_v17 = vsel %vm379_vm12, %v380_v9, %v1379_v53  ;;  %v439_v19 = vand.u32 31, %v437_v6 }
  0x59   :  { %v1125_v61 = vmin.u32 %v285_v3, %v1382_v57  ;;  %v1401_v56 = vshll.u32 %v433_v4, 8  ;;  %vm185_vm13 = vcmp.eq.f32.partialorder %v1339_v60, inf  ;;  %v188_v20 = vand.u32 2147483648, %v1339_v60 }
  0x5a   :  { %v1189_v15 = vpop.eup %1188  ;;  %v382_v21 = vadd.s32 %v381_v17, %v377_v7  ;;  %v1405_v22 = vshrl.u32 %v531_v11, 23  ;;  %v275_v23 = vadd.s32 %v1330_v50, %v1335_v55  ;;  %v195_v26 = vand.u32 2147483648, %v1374_v49 }
  0x5b   :  { %v287_v16 = vclz %v1125_v61  ;;  %v440_v27 = vsub.s32 32, %v439_v19  ;;  %v184_v28 = vmul.f32 %v1189_v15, %v1339_v60  ;;  %v305_v29 = vsub.s32 4, %v1360_v36 }
  0x5c   :  { %v383_v30 = vadd.s32 536870912, %v382_v21  ;;  %v176_v31 = vmul.f32 0.6931472, %v1187_v40  ;;  %v1413_v32 = vshrl.u32 %v437_v6, 5  ;;  %v442_v35 = vshll.u32 %v1261_v8, %v439_v19 }
  0x5d   :  { %v1126_v25 = vadd.s32 4294967294, %v287_v16  ;;  %v445_v37 = vshll.u32 %v1262_v10, %v439_v19  ;;  %v443_v38 = vshrl.u32 %v1262_v10, %v440_v27  ;;  %v448_v41 = vshll.u32 %v1263_v12, %v439_v19 }
  0x5e   :  { %v1417_v55 = vshrl.u32 %v383_v30, 30  ;;  %v446_v40 = vshrl.u32 %v1263_v12, %v440_v27  ;;  %v449_v63 = vshrl.u32 %v1264_v14, %v440_v27  ;;  %v451_v46 = vshll.u32 %v1264_v14, %v439_v19 }
  0x5f   :  { %vm1127_vm15 = vcmp.lt.s32.totalorder %v1126_v25, 0  ;;  %v452_v48 = vshrl.u32 %v1265_v18, %v440_v27  ;;  %v454_v58 = vshll.u32 %v1265_v18, %v439_v19  ;;  %v455_v62 = vshrl.u32 %v1266_v24, %v440_v27 }
  0x60   :  { %v290_v50 = vsel %vm1127_vm15, 0, %v1126_v25  ;;  %v385_v54 = vshll.u32 %v1417_v55, 30  ;;  %v1436_v3 = vmul.f32 -2.0, %v176_v31  ;;  %v441_v4 = vshrl.u32 %v1261_v8, %v440_v27 }
  0x61   :  { %v291_v42 = vsub.s32 32, %v290_v50  ;;  %v292_v43 = vshll.u32 %v1382_v57, %v290_v50  ;;  %v295_v45 = vsub.s32 4294967266, %v290_v50  ;;  %v1432_v57 = vsel %vm185_vm13, %v1339_v60, %v184_v28 }
  0x62   :  { %v1434_v1 = vsub.s32 %v382_v21, %v385_v54  ;;  %v444_v6 = vor.u32 %v443_v38, %v442_v35  ;;  %v447_v15 = vor.u32 %v446_v40, %v445_v37  ;;  %v450_v17 = vor.u32 %v449_v63, %v448_v41 }
  0x63   :  { %v293_v2 = vshrl.u32 %v275_v23, %v291_v42  ;;  %v296_v53 = vadd.s32 127, %v295_v45  ;;  %v1191_v7 = vpop.eup %1190  ;;  %v453_v19 = vor.u32 %v452_v48, %v451_v46  ;;  %vm457_vm1 = vcmp.lt.s32.totalorder %v1413_v32, 1 }
  0x64   :  { %v388_v16 = vsub.s32 0, %v1434_v1  ;;  %v306_v25 = vsel %vm221_vm14, %v305_v29, %v1360_v36  ;;  %v456_v44 = vor.u32 %v455_v62, %v454_v58  ;;  %v191_v27 = vmul.f32 %v1191_v7, %v1374_v49 }
  0x65   :  { %v294_v11 = vor.u32 %v293_v2, %v292_v43  ;;  %v297_v61 = vshll.u32 %v296_v53, 23  ;;  %vm192_vm2 = vcmp.eq.f32.partialorder %v1374_v49, inf  ;;  %vm458_vm3 = vcmp.lt.s32.totalorder %v1413_v32, 2 }
  0x66   :  { %v1129_v28 = vmin.u32 %v388_v16, %v1434_v1  ;;  %vm459_vm4 = vcmp.lt.s32.totalorder %v1413_v32, 3  ;;  %vm460_vm5 = vcmp.lt.s32.totalorder %v1413_v32, 4  ;;  %v461_v31 = vsel %vm457_vm1, %v441_v4, %v444_v6 }
  0x67   :  { %v298_v21 = vor.u32 4788187, %v297_v61  ;;  %v301_v23 = vcvt.s32.f32 %v294_v11  ;;  %v465_v36 = vsel %vm457_vm1, %v444_v6, %v447_v15  ;;  %vm187_vm6 = vcmp.eq.f32.partialorder %v1339_v60, 0.0 }
  0x68   :  { %v390_v29 = vclz %v1129_v28  ;;  %v462_v35 = vsel %vm460_vm5, %v450_v17, 2102212464  ;;  %v466_v37 = vsel %vm460_vm5, %v453_v19, 920167782  ;;  %v469_v50 = vsel %vm457_vm1, %v447_v15, %v450_v17 }
  0x69   :  { %v299_v30 = vand.u32 2147483647, %v298_v21  ;;  %vm194_vm7 = vcmp.eq.f32.partialorder %v1374_v49, 0.0  ;;  %vm324_vm8 = vcmp.lt.s32.totalorder %v1294_v34, 0  ;;  %v463_v41 = vsel %vm459_vm4, %v447_v15, %v462_v35 }
  0x6a   :  { %v467_v42 = vsel %vm459_vm4, %v450_v17, %v466_v37  ;;  %v470_v43 = vsel %vm460_vm5, %v456_v44, 1326507024  ;;  %v378_v45 = vadd.s32 %v1378_v51, %v1387_v0  ;;  %v1130_v40 = vadd.s32 4294967294, %v390_v29 }
  0x6b   :  { %v302_v38 = vmul.f32 %v301_v23, %v299_v30  ;;  %v468_v54 = vsel %vm458_vm3, %v465_v36, %v467_v42  ;;  %v471_v63 = vsel %vm459_vm4, %v453_v19, %v470_v43  ;;  %vm1483_vm9 = vcmp.le.f32.partialorder %v322_v52, 0.7853982 }
  0x6c   :  { %v472_v48 = vsel %vm458_vm3, %v469_v50, %v471_v63  ;;  %v1478_v2 = vmul.u32.u64.low %v1401_v56, %v468_v54  ;;  %v1479_v53 = vmul.u32.u64.high %v1401_v56, %v468_v54, %v1478_v2  ;;  %vm1131_vm10 = vcmp.lt.s32.totalorder %v1130_v40, 0 }
  0x6d   :  { %v303_v46 = vxor.u32 2147483648, %v302_v38  ;;  %v464_v51 = vsel %vm458_vm3, %v461_v31, %v463_v41  ;;  %v1490_v0 = vmul.u32.u64.low %v1401_v56, %v472_v48  ;;  %v1491_v62 = vmul.u32.u64.high %v1401_v56, %v472_v48, %v1490_v0 }
  0x6e   :  { %v393_v7 = vsel %vm1131_vm10, 0, %v1130_v40  ;;  %v408_v11 = vsub.s32 4, %v1417_v55  ;;  %v1136_v61 = vadd.s32 4294967169, %v1405_v22  ;;  %v308_v16 = vsel %vm1441_vm0, 0, %v306_v25 }
  0x6f   :  { %v304_v4 = vsel %vm221_vm14, %v303_v46, %v302_v38  ;;  %v394_v6 = vsub.s32 32, %v393_v7  ;;  %v395_v32 = vshll.u32 %v1434_v1, %v393_v7  ;;  %v398_v15 = vsub.s32 4294967266, %v393_v7 }
  0x70   :  { %v307_v52 = vsel %vm1441_vm0, %v1292_v33, %v304_v4  ;;  %v480_v17 = vmul.u32 %v1401_v56, %v464_v51  ;;  %v483_v19 = vadd.s32 1, %v1479_v53  ;;  %v1505_v21 = vand.u32 3, %v308_v16 }
  0x71   :  { %1192 = vcosq.f32 %v307_v52  ;;  %v396_v22 = vshrl.u32 %v378_v45, %v394_v6  ;;  %v399_v23 = vadd.s32 127, %v398_v15  ;;  %v193_v44 = vsel %vm192_vm2, %v1374_v49, %v191_v27 }
  0x72   :  { %1194 = vsinq.f32 %v307_v52  ;;  %vm482_vm11 = vc.u32 %v1491_v62, %v1478_v2  ;;  %v535_v1 = vand.u32 8388607, %v528_v5  ;;  %v538_v9 = vadd.s32 1, %v1136_v61 }
  0x73   :  { %v397_v25 = vor.u32 %v396_v22, %v395_v32  ;;  %v400_v28 = vshll.u32 %v399_v23, 23  ;;  %v409_v56 = vsel %vm324_vm8, %v408_v11, %v1417_v55  ;;  %v484_v30 = vsel %vm482_vm11, %v483_v19, %v1479_v53 }
  0x74   :  { %v1522_v27 = vsel %vm187_vm6, %v188_v20, %v1432_v57  ;;  %1196 = vrsqrt.f32 %v1436_v3  ;;  %v485_v31 = vadd.s32 %v484_v30, %v480_v17  ;;  %vm539_vm12 = vcmp.gt.s32.totalorder %v538_v9, 0 }
  0x75   :  { %v1529_v36 = vsel %vm194_vm7, %v195_v26, %v193_v44  ;;  %v401_v55 = vor.u32 4788187, %v400_v28  ;;  %v404_v29 = vcvt.s32.f32 %v397_v25  ;;  %v540_v35 = vsel %vm539_vm12, %v538_v9, 0 }
  0x76   :  { %vm314_vm13 = vcmp.eq.s32.totalorder %v1505_v21, 0  ;;  %v411_v60 = vsel %vm1483_vm9, 0, %v409_v56  ;;  %v486_v20 = vadd.s32 536870912, %v485_v31  ;;  %v542_v57 = vand.u32 31, %v540_v35 }
  0x77   :  { %vm313_vm14 = vcmp.lt.s32.totalorder %v1505_v21, 2  ;;  %vm317_vm15 = vcmp.eq.s32.totalorder %v1505_v21, 2  ;;  %v402_v37 = vand.u32 2147483647, %v401_v55  ;;  %v1536_v50 = vand.u32 3, %v411_v60 }
  0x78   :  { %v536_v49 = vor.u32 8388608, %v535_v1  ;;  %vm311_vm0 = vweird.f32 %v1292_v33  ;;  %v1539_v26 = vshrl.u32 %v486_v20, 30  ;;  %v543_v38 = vsub.s32 32, %v542_v57 }
  0x79   :  { %v545_v41 = vshll.u32 %v1261_v8, %v542_v57  ;;  %v744_v42 = vadd.s32 3, %v308_v16  ;;  %v405_v43 = vmul.f32 %v404_v29, %v402_v37  ;;  %v1543_v45 = vadd.s32 %v1478_v2, %v1491_v62 }
  0x7a   :  { %v548_v40 = vshll.u32 %v1262_v10, %v542_v57  ;;  %v551_v54 = vshll.u32 %v1263_v12, %v542_v57  ;;  %v488_v63 = vshll.u32 %v1539_v26, 30  ;;  %v546_v46 = vshrl.u32 %v1262_v10, %v543_v38 }
  0x7b   :  { %v554_v48 = vshll.u32 %v1264_v14, %v542_v57  ;;  %v848_v53 = vadd.s32 3, %v411_v60  ;;  %v406_v51 = vxor.u32 2147483648, %v405_v43  ;;  %v549_v0 = vshrl.u32 %v1263_v12, %v543_v38  ;;  %v215_v60 = vld [vmem:[#allocation4] sm:$0xff] }
  0x7c   :  { %v552_v4 = vshrl.u32 %v1264_v14, %v543_v38  ;;  %v555_v7 = vshrl.u32 %v1265_v18, %v543_v38  ;;  %v1553_v2 = vsub.s32 %v485_v31, %v488_v63  ;;  %v547_v62 = vor.u32 %v546_v46, %v545_v41 }
  0x7d   :  { %v1555_v11 = vshll.u32 %v536_v49, 8  ;;  %v1557_v61 = vand.u32 3, %v744_v42  ;;  %v407_v10 = vsel %vm324_vm8, %v406_v51, %v405_v43  ;;  %v541_v6 = vshrl.u32 %v540_v35, 5 }
  0x7e   :  { %v1559_v52 = vpop.eup %1192  ;;  %v550_v32 = vor.u32 %v549_v0, %v548_v40  ;;  %v553_v15 = vor.u32 %v552_v4, %v551_v54  ;;  %v410_v16 = vsel %vm1483_vm9, %v1294_v34, %v407_v10  ;;  %v491_v17 = vsub.s32 0, %v1553_v2 }
  0x7f   :  { %v1195_v12 = vpop.eup %1194  ;;  %v318_v14 = vxor.u32 2147483648, %v1559_v52  ;;  %v1568_v19 = vand.u32 3, %v848_v53  ;;  %1198 = vcosq.f32 %v410_v16  ;;  %v556_v23 = vor.u32 %v555_v7, %v554_v48 }
  0x80   :  { %v315_v22 = vxor.u32 2147483648, %v1195_v12  ;;  %v557_v44 = vshll.u32 %v1265_v18, %v542_v57  ;;  %1200 = vsinq.f32 %v410_v16  ;;  %v1133_v9 = vmin.u32 %v491_v17, %v1553_v2 }
  0x81   :  { %v319_v1 = vsel %vm317_vm15, %v318_v14, %v1195_v12  ;;  %v544_v25 = vshrl.u32 %v1261_v8, %v543_v38  ;;  %v1575_v28 = vpop.eup %1196  ;;  %vm746_vm1 = vcmp.lt.s32.totalorder %v1557_v61, 2  ;;  %vm747_vm2 = vcmp.eq.s32.totalorder %v1557_v61, 0 }
  0x82   :  { %v316_v58 = vsel %vm314_vm13, %v1559_v52, %v315_v22  ;;  %vm750_vm3 = vcmp.eq.s32.totalorder %v1557_v61, 2  ;;  %v493_v56 = vclz %v1133_v9  ;;  %v558_v30 = vshrl.u32 %v1266_v24, %v543_v38 }
  0x83   :  { %v320_v18 = vsel %vm313_vm14, %v316_v58, %v319_v1  ;;  %vm560_vm4 = vcmp.lt.s32.totalorder %v541_v6, 1  ;;  %vm561_vm5 = vcmp.lt.s32.totalorder %v541_v6, 2  ;;  %vm562_vm6 = vcmp.lt.s32.totalorder %v541_v6, 3  ;;  %v647_v58 = vld [vmem:[#allocation4 + $0x20] sm:$0xff] }
  0x84   :  { %v321_v8 = vsel %vm311_vm0, nan, %v320_v18  ;;  %vm563_vm7 = vcmp.lt.s32.totalorder %v541_v6, 4  ;;  %vm420_vm8 = vcmp.eq.s32.totalorder %v1536_v50, 2  ;;  %v1134_v55 = vadd.s32 4294967294, %v493_v56 }
  0x85   :  { %v631_v31 = vmul.f32 %v321_v8, %v1522_v27  ;;  %v559_v29 = vor.u32 %v558_v30, %v557_v44  ;;  %v564_v35 = vsel %vm560_vm4, %v544_v25, %v547_v62  ;;  %vm417_vm9 = vcmp.eq.s32.totalorder %v1536_v50, 0 }
  0x86   :  { %v565_v21 = vsel %vm563_vm7, %v553_v15, 2102212464  ;;  %v568_v24 = vsel %vm560_vm4, %v547_v62, %v550_v32  ;;  %v569_v20 = vsel %vm563_vm7, %v556_v23, 920167782  ;;  %v572_v57 = vsel %vm560_vm4, %v550_v32, %v553_v15 }
  0x87   :  { %v635_v37 = vmul.f32 0.1, %v631_v31  ;;  %vm416_vm10 = vcmp.lt.s32.totalorder %v1536_v50, 2  ;;  %vm1135_vm11 = vcmp.lt.s32.totalorder %v1134_v55, 0  ;;  %v566_v49 = vsel %vm562_vm6, %v550_v32, %v565_v21 }
  0x88   :  { %v570_v38 = vsel %vm562_vm6, %v553_v15, %v569_v20  ;;  %vm414_vm12 = vweird.f32 %v1294_v34  ;;  %v496_v41 = vsel %vm1135_vm11, 0, %v1134_v55  ;;  %v567_v42 = vsel %vm561_vm5, %v564_v35, %v566_v49 }
  0x89   :  { %v571_v43 = vsel %vm561_vm5, %v568_v24, %v570_v38  ;;  %v573_v40 = vsel %vm563_vm7, %v559_v29, 1326507024  ;;  %v639_v54 = vadd.f32 %v635_v37, %v215_v60  ;;  %v497_v63 = vsub.s32 32, %v496_v41  ;;  %v216_v37 = vld [vmem:[#allocation4 + $0x8] sm:$0xff] }
  0x8a   :  { %v498_v46 = vshll.u32 %v1553_v2, %v496_v41  ;;  %v501_v48 = vsub.s32 4294967266, %v496_v41  ;;  %v574_v53 = vsel %vm562_vm6, %v556_v23, %v573_v40  ;;  %v583_v4 = vmul.u32 %v1555_v11, %v567_v42 }
  0x8b   :  { %v1603_v51 = vmul.u32.u64.low %v1555_v11, %v571_v43  ;;  %v1604_v0 = vmul.u32.u64.high %v1555_v11, %v571_v43, %v1603_v51  ;;  %643 = vst [vmem:[#allocation7] sm:$0xff] %v639_v54  ;;  %v499_v7 = vshrl.u32 %v1543_v45, %v497_v63  ;;  %v575_v10 = vsel %vm561_vm5, %v572_v57, %v574_v53  ;;  %v648_v43 = vld [vmem:[#allocation4 + $0x28] sm:$0xff] }
  0x8c   :  { %v502_v62 = vadd.s32 127, %v501_v48  ;;  %v749_v32 = vsel %vm747_vm2, %v1559_v52, %v315_v22  ;;  %v1613_v2 = vmul.u32.u64.low %v1555_v11, %v575_v10  ;;  %v1614_v15 = vmul.u32.u64.high %v1555_v11, %v575_v10, %v1613_v2  ;;  %v1199_v17 = vpop.eup %1198 }
  0x8d   :  { %v752_v16 = vsel %vm750_vm3, %v318_v14, %v1195_v12  ;;  %vm850_vm13 = vcmp.lt.s32.totalorder %v1568_v19, 2  ;;  %v500_v23 = vor.u32 %v499_v7, %v498_v46  ;;  %vm851_vm14 = vcmp.eq.s32.totalorder %v1568_v19, 0  ;;  %v1201_v6 = vpop.eup %1200 }
  0x8e   :  { %v503_v44 = vshll.u32 %v502_v62, 23  ;;  %v753_v45 = vsel %vm746_vm1, %v749_v32, %v752_v16  ;;  %v421_v1 = vxor.u32 2147483648, %v1199_v17  ;;  %v586_v52 = vadd.s32 1, %v1604_v0 }
  0x8f   :  { %v754_v11 = vsel %vm311_vm0, nan, %v753_v45  ;;  %vm854_vm15 = vcmp.eq.s32.totalorder %v1568_v19, 2  ;;  %v418_v12 = vxor.u32 2147483648, %v1201_v6  ;;  %v507_v22 = vcvt.s32.f32 %v500_v23 }
  0x90   :  { %v504_v14 = vor.u32 4788187, %v503_v44  ;;  %v1067_v9 = vmul.f32 %v754_v11, %v1522_v27  ;;  %v422_v61 = vsel %vm420_vm8, %v421_v1, %v1201_v6  ;;  %v1630_v25 = vadd.s32 %v1603_v51, %v1614_v15 }
  0x91   :  { %vm585_vm1 = vc.u32 %v1614_v15, %v1603_v51  ;;  %v856_v18 = vsel %vm854_vm15, %v421_v1, %v1201_v6  ;;  %v419_v33 = vsel %vm417_vm9, %v1199_v17, %v418_v12  ;;  %vm427_vm0 = vcmp.lt.s32.totalorder %v1304_v59, 0 }
  0x92   :  { %v505_v56 = vand.u32 2147483647, %v504_v14  ;;  %v587_v30 = vsel %vm585_vm1, %v586_v52, %v1604_v0  ;;  %v1071_v8 = vmul.f32 0.1, %v1067_v9  ;;  %v423_v27 = vsel %vm416_vm10, %v419_v33, %v422_v61 }
  0x93   :  { %v588_v31 = vadd.s32 %v587_v30, %v583_v4  ;;  %v853_v55 = vsel %vm851_vm14, %v1199_v17, %v418_v12  ;;  %v424_v29 = vsel %vm414_vm12, nan, %v423_v27  ;;  %v511_v20 = vsub.s32 4, %v1539_v26 }
  0x94   :  { %v508_v35 = vmul.f32 %v507_v22, %v505_v56  ;;  %v1075_v60 = vadd.f32 %v1071_v8, %v647_v58  ;;  %v857_v21 = vsel %vm850_vm13, %v853_v55, %v856_v18  ;;  %v632_v24 = vmul.f32 %v424_v29, %v1529_v36 }
  0x95   :  { %v589_v50 = vadd.s32 536870912, %v588_v31  ;;  %v858_v57 = vsel %vm414_vm12, nan, %v857_v21  ;;  %vm1651_vm2 = vcmp.le.f32.partialorder %v425_v47, 0.7853982  ;;  %1202 = vlog2.f32 %v1397_v13 }
  0x96   :  { %v509_v38 = vxor.u32 2147483648, %v508_v35  ;;  %1079 = vst [vmem:[#allocation7 + $0x20] sm:$0xff] %v1075_v60  ;;  %v1068_v19 = vmul.f32 %v858_v57, %v1529_v36  ;;  %v636_v41 = vmul.f32 0.1, %v632_v24  ;;  %v512_v47 = vsel %vm427_vm0, %v511_v20, %v1539_v26 }
  0x97   :  { %v1657_v42 = vshrl.u32 %v589_v50, 30  ;;  %v514_v48 = vsel %vm1651_vm2, 0, %v512_v47  ;;  %v198_v26 = vmul.f32 %v1575_v28, %v1436_v3  ;;  %vm199_vm3 = vcmp.eq.f32.partialorder %v1436_v3, inf }
  0x98   :  { %v510_v34 = vsel %vm427_vm0, %v509_v38, %v508_v35  ;;  %v1072_v40 = vmul.f32 0.1, %v1068_v19  ;;  %v640_v54 = vadd.f32 %v636_v41, %v216_v37  ;;  %v952_v0 = vadd.s32 3, %v514_v48  ;;  %v217_v35 = vld [vmem:[#allocation4 + $0x10] sm:$0xff] }
  0x99   :  { %v513_v13 = vsel %vm1651_vm2, %v1304_v59, %v510_v34  ;;  %v591_v63 = vshll.u32 %v1657_v42, 30  ;;  %v518_v7 = vand.u32 3, %v514_v48  ;;  %vm201_vm4 = vcmp.eq.f32.partialorder %v1436_v3, 0.0 }
  0x9a   :  { %1204 = vcosq.f32 %v513_v13  ;;  %v1076_v36 = vadd.f32 %v1072_v40, %v648_v43  ;;  %644 = vst [vmem:[#allocation7 + $0x8] sm:$0xff] %v640_v54  ;;  %v953_v32 = vand.u32 3, %v952_v0  ;;  %v202_v2 = vand.u32 2147483648, %v1436_v3 }
  0x9b   :  { %1206 = vsinq.f32 %v513_v13  ;;  %v592_v46 = vsub.s32 %v588_v31, %v591_v63  ;;  %v200_v15 = vsel %vm199_vm3, %v1436_v3, %v198_v26  ;;  %vm523_vm6 = vcmp.eq.s32.totalorder %v518_v7, 2 }
  0x9c   :  { %1080 = vst [vmem:[#allocation7 + $0x28] sm:$0xff] %v1076_v36  ;;  %vm958_vm7 = vcmp.eq.s32.totalorder %v953_v32, 2  ;;  %vm519_vm8 = vcmp.lt.s32.totalorder %v518_v7, 2  ;;  %vm520_vm9 = vcmp.eq.s32.totalorder %v518_v7, 0  ;;  %vm955_vm10 = vcmp.eq.s32.totalorder %v953_v32, 0 }
  0x9d   :  { %v594_v53 = vsub.s32 0, %v592_v46  ;;  %vm954_vm11 = vcmp.lt.s32.totalorder %v953_v32, 2  ;;  %v203_v14 = vsel %vm201_vm4, %v202_v2, %v200_v15  ;;  %vm517_vm12 = vweird.f32 %v1304_v59  ;;  %v649_v59 = vld [vmem:[#allocation4 + $0x30] sm:$0xff] }
  0x9e   :  { %vm530_vm13 = vcmp.lt.s32.totalorder %v1365_v39, 0  ;;  %v614_v57 = vsub.s32 4, %v1657_v42  ;;  %vm529_vm14 = vcmp.le.f32.partialorder %v528_v5, 0.7853982 }
  0x9f   :  { %v1137_v51 = vmin.u32 %v594_v53, %v592_v46 }
  0xa0   :  { %v615_v19 = vsel %vm530_vm13, %v614_v57, %v1657_v42 }
  0xa1   :  { %v596_v4 = vclz %v1137_v51  ;;  %v617_v43 = vsel %vm529_vm14, 0, %v615_v19 }
  0xa2   :  { %v1203_v62 = vpop.eup %1202  ;;  %v1056_v34 = vadd.s32 3, %v617_v43  ;;  %v621_v54 = vand.u32 3, %v617_v43 }
  0xa3   :  { %v1138_v10 = vadd.s32 4294967294, %v596_v4  ;;  %v178_v16 = vmul.f32 0.6931472, %v1203_v62 }
  0xa4   :  { %v1057_v47 = vand.u32 3, %v1056_v34  ;;  %vm626_vm0 = vcmp.eq.s32.totalorder %v621_v54, 2  ;;  %vm623_vm3 = vcmp.eq.s32.totalorder %v621_v54, 0 }
  0xa5   :  { %vm1139_vm5 = vcmp.lt.s32.totalorder %v1138_v10, 0  ;;  %v182_v30 = vmul.f32 -2.0, %v178_v16  ;;  %v218_v16 = vld [vmem:[#allocation4 + $0x18] sm:$0xff] }
  0xa6   :  { %v599_v17 = vsel %vm1139_vm5, 0, %v1138_v10  ;;  %vm1062_vm2 = vcmp.eq.s32.totalorder %v1057_v47, 2  ;;  %vm1059_vm4 = vcmp.eq.s32.totalorder %v1057_v47, 0  ;;  %vm622_vm5 = vcmp.lt.s32.totalorder %v621_v54, 2 }
  0xa7   :  { %v1205_v23 = vpop.eup %1204  ;;  %v600_v44 = vsub.s32 32, %v599_v17  ;;  %v601_v45 = vshll.u32 %v592_v46, %v599_v17  ;;  %v604_v28 = vsub.s32 4294967266, %v599_v17  ;;  %1208 = vrsqrt.f32 %v182_v30  ;;  %v650_v17 = vld [vmem:[#allocation4 + $0x38] sm:$0xff] }
  0xa8   :  { %v1207_v6 = vpop.eup %1206  ;;  %v524_v1 = vxor.u32 2147483648, %v1205_v23  ;;  %vm206_vm15 = vcmp.eq.f32.partialorder %v182_v30, inf  ;;  %vm208_vm1 = vcmp.eq.f32.partialorder %v182_v30, 0.0  ;;  %v209_v5 = vand.u32 2147483648, %v182_v30 }
  0xa9   :  { %v521_v52 = vxor.u32 2147483648, %v1207_v6  ;;  %v602_v11 = vshrl.u32 %v1630_v25, %v600_v44  ;;  %v605_v12 = vadd.s32 127, %v604_v28 }
  0xaa   :  { %v525_v22 = vsel %vm523_vm6, %v524_v1, %v1207_v6  ;;  %v960_v9 = vsel %vm958_vm7, %v524_v1, %v1207_v6  ;;  %vm1058_vm6 = vcmp.lt.s32.totalorder %v1057_v47, 2  ;;  %vm620_vm7 = vweird.f32 %v1365_v39 }
  0xab   :  { %v522_v61 = vsel %vm520_vm9, %v1205_v23, %v521_v52  ;;  %v603_v58 = vor.u32 %v602_v11, %v601_v45  ;;  %v606_v18 = vshll.u32 %v605_v12, 23  ;;  %v957_v33 = vsel %vm955_vm10, %v1205_v23, %v521_v52 }
  0xac   :  { %v526_v56 = vsel %vm519_vm8, %v522_v61, %v525_v22  ;;  %v961_v8 = vsel %vm954_vm11, %v957_v33, %v960_v9 }
  0xad   :  { %v527_v27 = vsel %vm517_vm12, nan, %v526_v56  ;;  %v607_v25 = vor.u32 4788187, %v606_v18  ;;  %v610_v31 = vcvt.s32.f32 %v603_v58  ;;  %v962_v55 = vsel %vm517_vm12, nan, %v961_v8 }
  0xae   :  { %v633_v29 = vmul.f32 %v527_v27, %v203_v14  ;;  %v1069_v3 = vmul.f32 %v962_v55, %v203_v14 }
  0xaf   :  { %v608_v60 = vand.u32 2147483647, %v607_v25 }
  0xb0   :  { %v637_v21 = vmul.f32 0.1, %v633_v29  ;;  %v1073_v24 = vmul.f32 0.1, %v1069_v3 }
  0xb1   :  { %v611_v20 = vmul.f32 %v610_v31, %v608_v60 }
  0xb2   :  { %v641_v50 = vadd.f32 %v637_v21, %v217_v35  ;;  %v1077_v37 = vadd.f32 %v1073_v24, %v649_v59 }
  0xb3   :  { %v612_v49 = vxor.u32 2147483648, %v611_v20 }
  0xb4   :  { %645 = vst [vmem:[#allocation7 + $0x10] sm:$0xff] %v641_v50  ;;  %1081 = vst [vmem:[#allocation7 + $0x30] sm:$0xff] %v1077_v37  ;;  %v1209_v40 = vpop.eup %1208 }
  0xb5   :  { %v613_v38 = vsel %vm530_vm13, %v612_v49, %v611_v20  ;;  %v205_v13 = vmul.f32 %v1209_v40, %v182_v30 }
  0xb6   :  { %v616_v41 = vsel %vm529_vm14, %v1365_v39, %v613_v38 }
  0xb7   :  { %1210 = vcosq.f32 %v616_v41  ;;  %v207_v46 = vsel %vm206_vm15, %v182_v30, %v205_v13 }
  0xb8   :  { %1212 = vsinq.f32 %v616_v41  ;;  %v210_v0 = vsel %vm208_vm1, %v209_v5, %v207_v46 }
  0xc4   :  { %v1211_v63 = vpop.eup %1210 }
  0xc5   :  { %v1213_v36 = vpop.eup %1212  ;;  %v627_v42 = vxor.u32 2147483648, %v1211_v63 }
  0xc6   :  { %v624_v48 = vxor.u32 2147483648, %v1213_v36 }
  0xc7   :  { %v628_v53 = vsel %vm626_vm0, %v627_v42, %v1213_v36  ;;  %v1064_v51 = vsel %vm1062_vm2, %v627_v42, %v1213_v36 }
  0xc8   :  { %v625_v4 = vsel %vm623_vm3, %v1211_v63, %v624_v48  ;;  %v1061_v26 = vsel %vm1059_vm4, %v1211_v63, %v624_v48 }
  0xc9   :  { %v629_v7 = vsel %vm622_vm5, %v625_v4, %v628_v53  ;;  %v1065_v62 = vsel %vm1058_vm6, %v1061_v26, %v1064_v51 }
  0xca   :  { %v630_v10 = vsel %vm620_vm7, nan, %v629_v7  ;;  %v1066_v32 = vsel %vm620_vm7, nan, %v1065_v62 }
  0xcb   :  { %v634_v2 = vmul.f32 %v630_v10, %v210_v0  ;;  %v1070_v15 = vmul.f32 %v1066_v32, %v210_v0 }
  0xcd   :  { %v638_v23 = vmul.f32 0.1, %v634_v2  ;;  %v1074_v44 = vmul.f32 0.1, %v1070_v15 }
  0xcf   :  { %v642_v45 = vadd.f32 %v638_v23, %v218_v16  ;;  %v1078_v28 = vadd.f32 %v1074_v44, %v650_v17 }
  0xd1   :  { %646 = vst [vmem:[#allocation7 + $0x18] sm:$0xff] %v642_v45  ;;  %1082 = vst [vmem:[#allocation7 + $0x38] sm:$0xff] %v1078_v28 }
  0xd2   :  { %1245 = shalt.err (!%p1242_p9)
}
  0xd3   :  { %1094 = dma.vmem_to_hbm [thread:$0]  %s1089_s1, 1024, %s1697_s2, [#allocation6], %s1259_s12, %s1259_s12, %s1260_s13  }
  0xd4   :  { %1256 = dma.done.wait [#allocation6], 1024  }
  0xd5   :  { %1257 = vsyncadd [#allocation6], 4294966272 }
  0xd6   :  { %1098 = vsyncpa [#allocation5], 1 }
  0xd7   :  { %1099 = vsyncpa [#allocation6], 1 }

</bundles_post_ra>
